<compile_context>
chip_gen: v7x
topology: tpu7x:2x2x1
jax: 0.10.0
libtpu: 0.0.40
codegen_flags: <defaults>
</compile_context>

<pallas_src>
import jax
import jax.numpy as jnp
from jax.experimental import pallas as pl
from jax.experimental.pallas import tpu as pltpu

_LANES = 128
_TARGET_BLOCK_BYTES = 1 << 20  # ~1 MiB of input per grid step


def _sigmoid_kernel(x_ref, o_ref):
    # Upcast to f32 inside the kernel (v5e VPU/EUP have no bf16 path);
    # HBM traffic stays in the native dtype.
    x = x_ref[...].astype(jnp.float32)
    # sigmoid(x) = 0.5 * (tanh(0.5 * x) + 1): single EUP op, full f32 accuracy.
    o_ref[...] = (0.5 * (jnp.tanh(0.5 * x) + 1.0)).astype(o_ref.dtype)


def _sublane_pack(dtype) -> int:
    # Rows per vreg: 8 for 32-bit, 16 for 16-bit, 32 for 8-bit dtypes.
    return max(8, 32 // jnp.dtype(dtype).itemsize)


@jax.jit
def sigmoid_pallas(x: jax.Array) -> jax.Array:
    """Elementwise sigmoid over an arbitrary-shaped floating array (Pallas TPU)."""
    assert jnp.issubdtype(x.dtype, jnp.floating), "sigmoid expects a floating dtype"
    orig_shape = x.shape
    total = x.size
    if total == 0:
        return x

    dtype = x.dtype
    x_flat = jnp.ravel(x)

    # Pad only if the flat length is not already lane-divisible (usually a no-op).
    padded = pl.cdiv(total, _LANES) * _LANES
    if padded != total:
        x_flat = jnp.pad(x_flat, (0, padded - total))
    rows = padded // _LANES
    x2d = x_flat.reshape(rows, _LANES)

    # Block sizing: ~1 MiB of input per step, rounded to the dtype's sublane packing.
    sub = _sublane_pack(dtype)
    target_rows = max(sub, _TARGET_BLOCK_BYTES // (_LANES * jnp.dtype(dtype).itemsize))
    target_rows = (target_rows // sub) * sub
    if rows <= target_rows:
        block_rows = rows        # single block == full array (always a legal block shape)
        grid = (1,)
    else:
        block_rows = target_rows  # multiple of (8,128); Pallas masks the ragged tail block
        grid = (pl.cdiv(rows, block_rows),)

    out2d = pl.pallas_call(
        _sigmoid_kernel,
        out_shape=jax.ShapeDtypeStruct((rows, _LANES), dtype),
        grid=grid,
        in_specs=[pl.BlockSpec((block_rows, _LANES), lambda i: (i, 0))],
        out_specs=pl.BlockSpec((block_rows, _LANES), lambda i: (i, 0)),
        compiler_params=pltpu.CompilerParams(
            dimension_semantics=("parallel",),  # shards grid across v7x's 2 TensorCores
        ),
    )(x2d)

    out_flat = out2d.reshape(-1)
    if padded != total:
        out_flat = out_flat[:total]
    return out_flat.reshape(orig_shape)


class ZtPallas:
    """JAX/Pallas equivalent of the PyTorch `Zt` module (no learnable params)."""

    def __init__(self):
        # ReLU exists in the PyTorch module but is never used in forward().
        pass

    def __call__(self, x: jax.Array) -> jax.Array:
        return sigmoid_pallas(x)


if __name__ == "__main__":
    key = jax.random.PRNGKey(0)
    # Small NCHW input, consistent with the module's image-like usage.
    x = jax.random.normal(key, (2, 4, 16, 16), dtype=jnp.float32)

    model = ZtPallas()
    out = jax.block_until_ready(model(x))

    ref = jax.nn.sigmoid(x)
    assert out.shape == x.shape and out.dtype == x.dtype
    assert jnp.max(jnp.abs(out - ref)) < 1e-5

    # Also exercise the native-bf16 I/O path (sublane packing = 16).
    x_bf16 = x.astype(jnp.bfloat16)
    out_bf16 = jax.block_until_ready(model(x_bf16))
    ref_bf16 = jax.nn.sigmoid(x.astype(jnp.float32)).astype(jnp.bfloat16)
    assert out_bf16.shape == x_bf16.shape and out_bf16.dtype == jnp.bfloat16
    assert jnp.max(jnp.abs(out_bf16.astype(jnp.float32) - ref_bf16.astype(jnp.float32))) < 1e-2

    print("KERNEL_OK")
</pallas_src>

<mosaic_0001>
module attributes {stable_mosaic.version = 11 : i64} {
  func.func @_sigmoid_kernel(%arg0: i32, %arg1: memref<16x128xf32, #tpu.memory_space<vmem>>, %arg2: memref<16x128xf32, #tpu.memory_space<vmem>>) attributes {dimension_semantics = [#tpu.dimension_semantics<parallel>], iteration_bounds = array<i64: 1>, scalar_prefetch = 0 : i64, scratch_operands = 0 : i64, tpu.core_type = #tpu.core_type<tc>, window_params = [{transform_indices = @transform_0, window_bounds = array<i64: 16, 128>}, {transform_indices = @transform_1, window_bounds = array<i64: 16, 128>}]} {
    %c0 = arith.constant 0 : index
    %c0_0 = arith.constant 0 : index
    %0 = vector.load %arg1[%c0, %c0_0] : memref<16x128xf32, #tpu.memory_space<vmem>>, vector<16x128xf32>
    %cst = arith.constant 5.000000e-01 : f32
    %1 = vector.broadcast %cst : f32 to vector<16x128xf32>
    %2 = arith.mulf %1, %0 : vector<16x128xf32>
    %3 = math.tanh %2 : vector<16x128xf32>
    %cst_1 = arith.constant 1.000000e+00 : f32
    %4 = vector.broadcast %cst_1 : f32 to vector<16x128xf32>
    %5 = arith.addf %3, %4 : vector<16x128xf32>
    %cst_2 = arith.constant 5.000000e-01 : f32
    %6 = vector.broadcast %cst_2 : f32 to vector<16x128xf32>
    %7 = arith.mulf %6, %5 : vector<16x128xf32>
    %c0_3 = arith.constant 0 : index
    %c0_4 = arith.constant 0 : index
    %8 = vector.load %arg2[%c0_3, %c0_4] : memref<16x128xf32, #tpu.memory_space<vmem>>, vector<16x128xf32>
    tpu.vector_store %arg2[%c0_3, %c0_4], %7 {strides = array<i32>} : memref<16x128xf32, #tpu.memory_space<vmem>>, vector<16x128xf32>,
    return
  }
  func.func @transform_0(%arg0: i32) -> (i32, i32) {
    %c0_i32 = arith.constant 0 : i32
    %c0_i32_0 = arith.constant 0 : i32
    return %arg0, %c0_i32 : i32, i32
  }
  func.func @transform_1(%arg0: i32) -> (i32, i32) {
    %c0_i32 = arith.constant 0 : i32
    %c0_i32_0 = arith.constant 0 : i32
    return %arg0, %c0_i32 : i32, i32
  }
}

</mosaic_0001>

<bundles_post_ra>
// kernel: sigmoid_pallas.1
= control target key start
LH: loop header
LB: loop body
LE: loop exit
PB: predicated region body
PF: predicated region fallthrough
CT: control target
= control target key end

     0   :  { %s50_s0 = inlined_call_operand.vmem [shape: f32[16,128], index: 0, kind: input, shape index: {}]   ;;  %s51_s1 = inlined_call_operand.vmem [shape: f32[16,128], index: 1, kind: output, shape index: {}]  }
   0x1   :  { %v8_v0 = vld [vmem:[%s50_s0] sm:$0xff]  ;;  %v9_v1 = vld [vmem:[%s50_s0 + $0x8] sm:$0xff] }
   0x2   :  { %v10_v2 = vmul.f32 0.5, %v8_v0  ;;  %v11_v3 = vmul.f32 0.5, %v9_v1 }
   0x4   :  { %24 = vtanh.f32 %v10_v2 }
   0x5   :  { %26 = vtanh.f32 %v11_v3 }
   0xe   :  { %v25_v4 = vpop.eup %24 }
   0xf   :  { %v27_v5 = vpop.eup %26  ;;  %v14_v6 = vadd.f32 1.0, %v25_v4 }
  0x10   :  { %v15_v7 = vadd.f32 1.0, %v27_v5 }
  0x11   :  { %v16_v8 = vmul.f32 0.5, %v14_v6 }
  0x12   :  { %v17_v9 = vmul.f32 0.5, %v15_v7 }
  0x13   :  { %18 = vst [vmem:[%s51_s1] sm:$0xff] %v16_v8 }
  0x14   :  { %19 = vst [vmem:[%s51_s1 + $0x8] sm:$0xff] %v17_v9 }

</bundles_post_ra>
